<compile_context>
chip_gen: v7x
topology: tpu7x:2x2x1
jax: 0.10.0
libtpu: 0.0.40
codegen_flags: <defaults>
</compile_context>

<pallas_src>
import functools

import jax
import jax.numpy as jnp
from jax import lax
from jax.experimental import pallas as pl
from jax.experimental.pallas import tpu as pltpu

_LANES = 128


def _cdiv(a, b):
    return -(-a // b)


def _contact_loss_kernel(pred_ref, targ_ref, out_ref, acc_ref, *,
                         scale, valid_rows, tile_rows, tiles_per_core,
                         need_mask):
    # pred_ref / targ_ref: (tile_rows, 128) blocks in native dtype.
    # out_ref: (1, 8, 128) f32 block, one per core (scaled partial, replicated).
    # acc_ref: (tile_rows, 128) f32 VMEM scratch, resident across the grid.
    c = pl.program_id(0)   # core split ("parallel")
    i = pl.program_id(1)   # tile reduction ("arbitrary")

    @pl.when(i == 0)
    def _():
        acc_ref[...] = jnp.zeros_like(acc_ref)

    diff = pred_ref[...].astype(jnp.float32) - targ_ref[...].astype(jnp.float32)
    sq = diff * diff

    if need_mask:
        # Kill stale rows of partial/overhang tiles (logical, unclamped index).
        g = c * tiles_per_core + i
        row0 = g * tile_rows
        rid = row0 + lax.broadcasted_iota(jnp.int32, sq.shape, 0)
        sq = jnp.where(rid < valid_rows, sq, 0.0)

    acc_ref[...] += sq   # pure VPU in the steady state; no per-step XLU reduce

    @pl.when(i == pl.num_programs(1) - 1)
    def _():
        total = jnp.sum(acc_ref[...]) * scale   # single cross-lane reduce
        out_ref[...] = jnp.full(out_ref.shape, total, dtype=jnp.float32)


def contact_loss(predict_seq, train_y, *, max_tile_bytes=1 << 20, num_cores=2):
    """JAX/Pallas equivalent of ContactLoss.forward.

    predict_seq: (B, T, Dp) with Dp >= 2
    train_y:     (B, T, Dt) with Dt >= 101
    returns: scalar f32 = 8 * MSE(predict_seq[..., -2:], train_y[..., 99:101])
    """
    # Glue: channel slicing (native dtype; kernel upcasts per tile).
    pred_slice = predict_seq[:, :, -2:]
    targ_slice = train_y[:, :, 99:101]

    n = pred_slice.size
    scale = 8.0 / float(n)

    pred_flat = pred_slice.reshape(-1)
    targ_flat = targ_slice.reshape(-1)

    rem = n % _LANES
    if rem:
        # Rare unaligned tail: pad flat vectors to a lane multiple (zeros in
        # both operands -> diff 0; `scale` uses the unpadded count).
        pad = _LANES - rem
        pred_flat = jnp.pad(pred_flat, (0, pad))
        targ_flat = jnp.pad(targ_flat, (0, pad))

    rows = pred_flat.size // _LANES           # == ceil(n / 128)
    pred2d = pred_flat.reshape(rows, _LANES)  # free: contiguous reshape
    targ2d = targ_flat.reshape(rows, _LANES)

    isz_p = pred2d.dtype.itemsize
    isz_t = targ2d.dtype.itemsize
    # Packed-sublane multiple of the narrowest dtype: 8 f32 / 16 bf16 / 32 i8.
    packing = max(8, 32 // max(1, min(isz_p, isz_t)))

    if rows <= packing:
        tile_rows = rows                      # full-extent block, no partials
    else:
        cap = min(max_tile_bytes // (_LANES * isz_p),
                  max_tile_bytes // (_LANES * isz_t))
        cap = max(packing, (cap // packing) * packing)
        tile_rows = min(cap, _cdiv(rows, packing) * packing)

    tiles_total = _cdiv(rows, tile_rows)
    n_cores = num_cores if tiles_total >= 2 else 1
    tiles_per_core = _cdiv(tiles_total, n_cores)
    overhang = n_cores * tiles_per_core != tiles_total
    need_mask = (rows % tile_rows != 0) or overhang

    if overhang:
        # Extra (c, i) slots past the last tile are clamped to the last block
        # (so the DMA stays in bounds) and fully masked in the kernel.
        def in_map(c, i):
            return (jnp.minimum(c * tiles_per_core + i, tiles_total - 1), 0)
    else:
        def in_map(c, i):
            return (c * tiles_per_core + i, 0)

    tile_in_bytes = tile_rows * _LANES * (isz_p + isz_t)
    acc_bytes = tile_rows * _LANES * 4
    # 2 pipeline buffers per input + accumulator + slack; comfortably under
    # v7x's 64 MiB physical VMEM and fine for v5e/v6e scoped limits.
    vmem_limit = int(max(4 << 20, 2 * tile_in_bytes + acc_bytes + (2 << 20)))

    kernel = functools.partial(
        _contact_loss_kernel, scale=scale, valid_rows=rows,
        tile_rows=tile_rows, tiles_per_core=tiles_per_core,
        need_mask=need_mask)

    out = pl.pallas_call(
        kernel,
        out_shape=jax.ShapeDtypeStruct((n_cores, 8, _LANES), jnp.float32),
        grid_spec=pltpu.PrefetchScalarGridSpec(
            num_scalar_prefetch=0,
            grid=(n_cores, tiles_per_core),
            in_specs=[
                pl.BlockSpec((tile_rows, _LANES), in_map),
                pl.BlockSpec((tile_rows, _LANES), in_map),
            ],
            out_specs=pl.BlockSpec((1, 8, _LANES), lambda c, i: (c, 0, 0)),
            scratch_shapes=[pltpu.VMEM((tile_rows, _LANES), jnp.float32)],
        ),
        compiler_params=pltpu.CompilerParams(
            dimension_semantics=("parallel", "arbitrary"),
            vmem_limit_bytes=vmem_limit,
        ),
        cost_estimate=pl.CostEstimate(
            flops=3 * rows * _LANES,
            transcendentals=0,
            bytes_accessed=rows * _LANES * (isz_p + isz_t)
            + n_cores * 8 * _LANES * 4,
        ),
    )(pred2d, targ2d)

    # Per-core scaled partial sums live at [:, 0, 0]; add them (single element
    # for single-tile inputs / 1-TC chips).
    return jnp.sum(out[:, 0, 0])


def contact_loss_ref(predict_seq, train_y):
    # pure-JAX reference for verification
    p = predict_seq[:, :, -2:].astype(jnp.float32)
    t = train_y[:, :, 99:101].astype(jnp.float32)
    return jnp.mean((p - t) ** 2) * 8.0


if __name__ == "__main__":
    key = jax.random.PRNGKey(0)
    k = jax.random.split(key, 6)

    # 1) Small f32 case: unaligned n -> padded single full-extent tile,
    #    grid (1, 1), no masking.
    B, T, Dp, Dt = 2, 8, 32, 112
    pred1 = jax.random.normal(k[0], (B, T, Dp), dtype=jnp.float32)
    ty1 = jax.random.normal(k[1], (B, T, Dt), dtype=jnp.float32)
    out1 = jax.block_until_ready(contact_loss(pred1, ty1))
    ref1 = contact_loss_ref(pred1, ty1)
    assert jnp.allclose(out1, ref1, rtol=1e-5, atol=1e-6), (out1, ref1)

    # 2) bf16, lane-aligned, multi-tile: exercises the vector VMEM accumulator
    #    and the 2-way core split (grid (2, 2), exact division, no masking).
    B2, T2 = 2, 2048
    pred2 = jax.random.normal(k[2], (B2, T2, 16), dtype=jnp.bfloat16)
    ty2 = jax.random.normal(k[3], (B2, T2, 112), dtype=jnp.bfloat16)
    out2 = jax.block_until_ready(
        contact_loss(pred2, ty2, max_tile_bytes=16 * _LANES * 2))
    ref2 = contact_loss_ref(pred2, ty2)
    assert jnp.allclose(out2, ref2, rtol=1e-4, atol=1e-4), (out2, ref2)

    # 3) f32, odd tile count: partial last tile + clamped overhang slot, both
    #    neutralized by the in-kernel row mask (grid (2, 2)).
    B3, T3 = 2, 1280
    pred3 = jax.random.normal(k[4], (B3, T3, 8), dtype=jnp.float32)
    ty3 = jax.random.normal(k[5], (B3, T3, 112), dtype=jnp.float32)
    out3 = jax.block_until_ready(
        contact_loss(pred3, ty3, max_tile_bytes=16 * _LANES * 4))
    ref3 = contact_loss_ref(pred3, ty3)
    assert jnp.allclose(out3, ref3, rtol=1e-5, atol=1e-6), (out3, ref3)

    print("KERNEL_OK")
</pallas_src>

<mosaic_0001>
module attributes {stable_mosaic.version = 11 : i64} {
  func.func @_contact_loss_kernel(%arg0: i32, %arg1: i32, %arg2: memref<1x128xf32, #tpu.memory_space<vmem>>, %arg3: memref<1x128xf32, #tpu.memory_space<vmem>>, %arg4: memref<1x8x128xf32, #tpu.memory_space<vmem>>, %arg5: memref<1x128xf32, #tpu.memory_space<vmem>>) attributes {dimension_semantics = [#tpu.dimension_semantics<parallel>, #tpu.dimension_semantics<arbitrary>], iteration_bounds = array<i64: 1, 1>, scalar_prefetch = 0 : i64, scratch_operands = 1 : i64, tpu.core_type = #tpu.core_type<tc>, window_params = [{transform_indices = @transform_0, window_bounds = array<i64: 1, 128>}, {transform_indices = @transform_1, window_bounds = array<i64: 1, 128>}, {transform_indices = @transform_2, window_bounds = array<i64: 1, 8, 128>}]} {
    %c0_i32 = arith.constant 0 : i32
    %0 = arith.cmpi eq, %arg1, %c0_i32 : i32
    %1 = arith.extui %0 : i1 to i32
    %c0_i32_0 = arith.constant 0 : i32
    %2 = arith.cmpi ne, %1, %c0_i32_0 : i32
    scf.if %2 {
      %cst = arith.constant 0.000000e+00 : f32
      %13 = vector.broadcast %cst : f32 to vector<1x128xf32>
      %c0_10 = arith.constant 0 : index
      %c0_11 = arith.constant 0 : index
      %14 = vector.load %arg5[%c0_10, %c0_11] : memref<1x128xf32, #tpu.memory_space<vmem>>, vector<1x128xf32>
      tpu.vector_store %arg5[%c0_10, %c0_11], %13 {strides = array<i32>} : memref<1x128xf32, #tpu.memory_space<vmem>>, vector<1x128xf32>,
    } else {
    }
    %c0 = arith.constant 0 : index
    %c0_1 = arith.constant 0 : index
    %3 = vector.load %arg2[%c0, %c0_1] : memref<1x128xf32, #tpu.memory_space<vmem>>, vector<1x128xf32>
    %c0_2 = arith.constant 0 : index
    %c0_3 = arith.constant 0 : index
    %4 = vector.load %arg3[%c0_2, %c0_3] : memref<1x128xf32, #tpu.memory_space<vmem>>, vector<1x128xf32>
    %5 = arith.subf %3, %4 : vector<1x128xf32>
    %6 = arith.mulf %5, %5 : vector<1x128xf32>
    %c0_4 = arith.constant 0 : index
    %c0_5 = arith.constant 0 : index
    %7 = vector.load %arg5[%c0_4, %c0_5] : memref<1x128xf32, #tpu.memory_space<vmem>>, vector<1x128xf32>
    %8 = arith.addf %7, %6 : vector<1x128xf32>
    %c0_6 = arith.constant 0 : index
    %c0_7 = arith.constant 0 : index
    %9 = vector.load %arg5[%c0_6, %c0_7] : memref<1x128xf32, #tpu.memory_space<vmem>>, vector<1x128xf32>
    tpu.vector_store %arg5[%c0_6, %c0_7], %8 {strides = array<i32>} : memref<1x128xf32, #tpu.memory_space<vmem>>, vector<1x128xf32>,
    %c0_i32_8 = arith.constant 0 : i32
    %10 = arith.cmpi eq, %arg1, %c0_i32_8 : i32
    %11 = arith.extui %10 : i1 to i32
    %c0_i32_9 = arith.constant 0 : i32
    %12 = arith.cmpi ne, %11, %c0_i32_9 : i32
    scf.if %12 {
      %c0_10 = arith.constant 0 : index
      %c0_11 = arith.constant 0 : index
      %13 = vector.load %arg5[%c0_10, %c0_11] : memref<1x128xf32, #tpu.memory_space<vmem>>, vector<1x128xf32>
      %14 = vector.shape_cast %13 : vector<1x128xf32> to vector<1x1x128xf32>
      %cst = arith.constant dense<0.000000e+00> : vector<1xf32>
      %15 = vector.multi_reduction <add>, %14, %cst [1, 2] : vector<1x1x128xf32> to vector<1xf32>
      %16 = vector.shape_cast %15 : vector<1xf32> to vector<1x1x1xf32>
      %17 = vector.extract %16[0, 0, 0] : f32 from vector<1x1x1xf32>
      %cst_12 = arith.constant 2.500000e-01 : f32
      %18 = arith.mulf %17, %cst_12 : f32
      %19 = vector.broadcast %18 : f32 to vector<1x8x128xf32>
      %c0_13 = arith.constant 0 : index
      %c0_14 = arith.constant 0 : index
      %c0_15 = arith.constant 0 : index
      %20 = vector.load %arg4[%c0_13, %c0_14, %c0_15] : memref<1x8x128xf32, #tpu.memory_space<vmem>>, vector<1x8x128xf32>
      tpu.vector_store %arg4[%c0_13, %c0_14, %c0_15], %19 {strides = array<i32>} : memref<1x8x128xf32, #tpu.memory_space<vmem>>, vector<1x8x128xf32>,
    } else {
    }
    return
  }
  func.func @transform_0(%arg0: i32, %arg1: i32) -> (i32, i32) {
    %c1_i32 = arith.constant 1 : i32
    %0 = arith.muli %arg0, %c1_i32 : i32
    %1 = arith.addi %0, %arg1 : i32
    %c0_i32 = arith.constant 0 : i32
    %c0_i32_0 = arith.constant 0 : i32
    return %1, %c0_i32 : i32, i32
  }
  func.func @transform_1(%arg0: i32, %arg1: i32) -> (i32, i32) {
    %c1_i32 = arith.constant 1 : i32
    %0 = arith.muli %arg0, %c1_i32 : i32
    %1 = arith.addi %0, %arg1 : i32
    %c0_i32 = arith.constant 0 : i32
    %c0_i32_0 = arith.constant 0 : i32
    return %1, %c0_i32 : i32, i32
  }
  func.func @transform_2(%arg0: i32, %arg1: i32) -> (i32, i32, i32) {
    %c0_i32 = arith.constant 0 : i32
    %c0_i32_0 = arith.constant 0 : i32
    %c0_i32_1 = arith.constant 0 : i32
    return %arg0, %c0_i32, %c0_i32_0 : i32, i32, i32
  }
}

</mosaic_0001>

<bundles_post_ra>
// kernel: tpu_custom_call.1
= control target key start
LH: loop header
LB: loop body
LE: loop exit
PB: predicated region body
PF: predicated region fallthrough
CT: control target
= control target key end

     0   :  { %7 = vsyncpa [#allocation4], 0  ;;  %s188_s0 = inlined_call_operand.hbm [shape: f32[1,128], index: 0, kind: input, shape index: {}]   ;;  %s189_s1 = inlined_call_operand.vmem [shape: f32[1,128], index: 1, kind: input, shape index: {}]   ;;  %s190_s2 = inlined_call_operand.hbm [shape: f32[1,8,128], index: 2, kind: output, shape index: {}]  }
   0x1   :  { %8 = vsyncpa [#allocation5], 0  ;;  %s143_s9 = smov [#allocation3]   ;;  %s95_s13 = scalar_lea.hbm %s188_s0, 16 }
   0x2   :  { %s18_s10 = sshll.u32 %s143_s9, 4  ;;  %p96_p0 = scmp.ne.s32.totalorder %s188_s0, %s95_s13  ;;  %s19_s10 = int_to_ptr.vmem [resolvable:$true] %s18_s10 }
   0x3   :  { %p99_p1 = scmp.lt.u32.totalorder %s95_s13, %s188_s0 }
   0x5   :  { %p101_p2 = pnand %p99_p1, %p96_p0 }
   0x7   :  { %104 = shalt.err (!%p101_p2)
}
   0x8   :  { %s105_s18 = scalar_lea.vmem %s19_s10, 16  ;;  %s109_s19 = scalar_lea.vmem %s19_s10, 32 }
   0x9   :  { %p106_p3 = scmp.ne.s32.totalorder %s19_s10, %s105_s18  ;;  %p110_p4 = scmp.lt.s32.totalorder %s19_s10, %s19_s10 }
   0xa   :  { %p111_p5 = scmp.lt.s32.totalorder %s109_s19, %s105_s18 }
   0xc   :  { %p112_p6 = por %p111_p5, %p110_p4 }
   0xe   :  { %p113_p7 = pnand %p112_p6, %p106_p3 }
  0x10   :  { %116 = shalt.err (!%p113_p7)
}
  0x11   :  { %21 = dma.hbm_to_vmem [thread:$0]  %s188_s0, 16, %s19_s10, [#allocation4]  }
  0x12   :  { %139 = dma.done.wait [#allocation4], 16  }
  0x13   :  { %140 = vsyncadd [#allocation4], 4294967280  ;;  %v144_v0 = vmov 0.0   ;;  %v47_v1 = vld [vmem:[#allocation3] sm:$0x1]  ;;  %vm58_vm0 = vcmask 1040384  }
  0x14   :  { %46 = vst [vmem:[#allocation2] sm:$0x1] %v144_v0  ;;  %v48_v2 = vld [vmem:[%s189_s1] sm:$0x1]  ;;  %s145_s0 = smov [#allocation6]  }
  0x15   :  { %v49_v3 = vsub.f32 %v47_v1, %v48_v2  ;;  %s78_s24 = sshll.u32 %s145_s0, 4  ;;  %s79_s24 = int_to_ptr.vmem [resolvable:$true] %s78_s24 }
  0x16   :  { %s117_s26 = scalar_lea.vmem %s79_s24, 128  ;;  %p122_p9 = scmp.lt.s32.totalorder %s79_s24, %s79_s24 }
  0x17   :  { %v50_v5 = vmul.f32 %v49_v3, %v49_v3  ;;  %p118_p8 = scmp.ne.s32.totalorder %s79_s24, %s117_s26  ;;  %p123_p10 = scmp.lt.s32.totalorder %s117_s26, %s117_s26 }
  0x19   :  { %p124_p11 = por %p123_p10, %p122_p9 }
  0x1b   :  { %v51_v4 = vld [vmem:[#allocation2] sm:$0x1]  ;;  %p125_p12 = pnand %p124_p11, %p118_p8 }
  0x1c   :  { %v52_v6 = vadd.f32 %v51_v4, %v50_v5 }
  0x1e   :  { %53 = vst [vmem:[#allocation2] sm:$0x1] %v52_v6 }
  0x25   :  { %v57_v7 = vld [vmem:[#allocation2] sm:$0x1] }
  0x26   :  { %v59_v8 = vsel %vm58_vm0, %v57_v7, 0.0 }
  0x27   :  { %60 = vadd.xlane.f32.xlu0 %v59_v8 }
  0xb4   :  { %v61_v9 = vpop.xlane.xlu0 %60 }
  0xb5   :  { %v62_v10 = vrot.slane %v61_v9, 4 }
  0xb7   :  { %v63_v11 = vadd.f32 %v62_v10, %v61_v9 }
  0xb9   :  { %v64_v12 = vrot.slane %v63_v11, 2 }
  0xbb   :  { %v65_v13 = vadd.f32 %v64_v12, %v63_v11 }
  0xbd   :  { %v66_v14 = vrot.slane %v65_v13, 1 }
  0xbf   :  { %v67_v15 = vadd.f32 %v66_v14, %v65_v13 }
  0xc1   :  { %90 = vpush %v67_v15 }
  0xf2   :  { %s91_s1 = spop %90 }
  0xf3   :  { %s69_s25 = smul.f32 0.25, %s91_s1 }
  0xf5   :  { %v70_v16 = vstv %s69_s25 }
  0xf6   :  { %71 = vst [vmem:[#allocation6] sm:$0xff] %v70_v16 }
  0xf7   :  { %128 = shalt.err (!%p125_p12)
}
  0xf8   :  { %s129_s29 = scalar_lea.hbm %s190_s2, 128 }
  0xf9   :  { %p130_p13 = scmp.ne.s32.totalorder %s190_s2, %s129_s29  ;;  %p133_p0 = scmp.lt.u32.totalorder %s129_s29, %s190_s2 }
  0xfb   :  { %p135_p1 = pnand %p133_p0, %p130_p13 }
  0xfd   :  { %138 = shalt.err (!%p135_p1)
}
  0xfe   :  { %81 = dma.vmem_to_hbm [thread:$0]  %s79_s24, 128, %s190_s2, [#allocation5]  }
  0xff   :  { %141 = dma.done.wait [#allocation5], 128  }
 0x100   :  { %142 = vsyncadd [#allocation5], 4294967168 }
 0x101   :  { %85 = vsyncpa [#allocation4], 1 }
 0x102   :  { %86 = vsyncpa [#allocation5], 1 }

</bundles_post_ra>
